<compile_context>
chip_gen: v7x
topology: tpu7x:2x2x1
jax: 0.10.0
libtpu: 0.0.40
codegen_flags: <defaults>
</compile_context>

<pallas_src>
import jax
import jax.numpy as jnp
import numpy as np
from jax import lax
from jax.experimental import pallas as pl
from jax.experimental.pallas import tpu as pltpu

# ---- Config mirroring ModelRNN params (small synthetic sizes) ----
B = 2          # batch
T = 8          # look_back (sequence length)
D = 16         # input_size (input_shape[-1])
H = 32         # hidden_size
P = 4          # predict_steps
LN_EPS = 1e-5  # nn.LayerNorm default eps


def model_rnn_kernel(x_ref, wproj_ref, bcat_ref, wcombo_ref,
                     wfold_ref, wsum_ref, cfold_ref, out_ref):
    # ----- hoisted loads (loaded once, reused across all unrolled steps) -----
    wcombo = wcombo_ref[...]                    # (2H, 2H)  = [[Whh0^T, Wih1^T], [0, Whh1^T]]
    bcat = bcat_ref[...]                        # (1, 2H)   = [b0 | b1]

    # ----- ONE batched projection producing the full per-step additive term -----
    # xb[:, t, :H] = x_t @ Wih0^T + b0 ; xb[:, t, H:] = b1   (leading-dim reshapes only)
    x_flat = x_ref[...].astype(jnp.float32).reshape(B * T, D)
    xb = (jnp.dot(x_flat, wproj_ref[...], preferred_element_type=jnp.float32)
          + bcat).reshape(B, T, 2 * H)

    # ----- peeled iteration 0: layer-0 only (h0_init = 0), layer-1 state stays zero -----
    h0_0 = jnp.tanh(xb[:, 0, :H])                                        # seq0[0]
    state = jnp.concatenate([h0_0, jnp.zeros((B, H), jnp.float32)], axis=-1)   # (B, 2H)

    # ----- fused staggered recurrence: one (B,2H)@(2H,2H) MXU push + vadd + tanh per step -----
    # state_i = [seq0[i-1], seq1[i-2]] ; after the update state = [seq0[i], seq1[i-1]].
    s1 = jnp.zeros((B, 1), jnp.float32)         # running sum of seq1 (for LayerNorm mean)
    s2 = jnp.zeros((B, 1), jnp.float32)         # running sum of seq1^2 (for LayerNorm var)
    tail = []                                   # last P layer-1 hidden states (stay in vregs)
    for i in range(1, T + 1):                   # T is small & static -> fully unrolled
        # last iteration has no layer-0 input step: additive term is just the biases;
        # its h0 half result is garbage and never used.
        add = xb[:, i, :] if i < T else bcat
        state = jnp.tanh(jnp.dot(state, wcombo,
                                 preferred_element_type=jnp.float32) + add)
        h1 = state[:, H:]                       # = seq1[i-1]; off the recurrence critical path
        s1 = s1 + jnp.sum(h1, axis=-1, keepdims=True)
        s2 = s2 + jnp.sum(h1 * h1, axis=-1, keepdims=True)
        if i - 1 >= T - P:
            tail.append(h1)

    # ----- LayerNorm stats over all [T, H] elements (biased variance, matches nn.LayerNorm) -----
    inv_n = 1.0 / float(T * H)
    mean = s1 * inv_n                           # (B, 1)
    var = s2 * inv_n - mean * mean
    inv_std = lax.rsqrt(var + LN_EPS)           # (B, 1)

    # ----- LN affine + fc folded into host weights; only the last P steps computed -----
    # logits[..., k] = inv_std * (sum_h(tail * wfold_k) - mean * wsum_k) + cfold_k
    tail_v = jnp.stack(tail, axis=1)            # (B, P, H)
    wf = wfold_ref[...]                         # (2, P, H)
    d0 = jnp.sum(tail_v * wf[0][None], axis=-1, keepdims=True)    # (B, P, 1)
    d1 = jnp.sum(tail_v * wf[1][None], axis=-1, keepdims=True)
    dots = jnp.concatenate([d0, d1], axis=-1)                     # (B, P, 2)
    logits = (inv_std[:, :, None] * (dots - mean[:, :, None] * wsum_ref[...])
              + cfold_ref[...])
    out_ref[...] = jax.nn.sigmoid(logits).astype(out_ref.dtype)


def model_rnn_forward(x, kp):
    vmem = pl.BlockSpec(memory_space=pltpu.MemorySpace.VMEM)
    args = (x, kp['wproj'], kp['bcat'], kp['wcombo'],
            kp['wfold'], kp['wsum'], kp['cfold'])
    return pl.pallas_call(
        model_rnn_kernel,
        out_shape=jax.ShapeDtypeStruct((B, P, 2), jnp.float32),
        in_specs=[vmem] * len(args),
        out_specs=vmem,
    )(*args)


def init_torch_params(key):
    """Deterministic init mimicking PyTorch uniform(-1/sqrt(H), 1/sqrt(H))."""
    k = 1.0 / np.sqrt(H)
    keys = jax.random.split(key, 10)
    u = lambda kk, shape, b: jax.random.uniform(kk, shape, jnp.float32, -b, b)
    return {
        'wih0': u(keys[0], (H, D), k), 'whh0': u(keys[1], (H, H), k),
        'bih0': u(keys[2], (H,), k),   'bhh0': u(keys[3], (H,), k),
        'wih1': u(keys[4], (H, H), k), 'whh1': u(keys[5], (H, H), k),
        'bih1': u(keys[6], (H,), k),   'bhh1': u(keys[7], (H,), k),
        'fc_w': u(keys[8], (2, H), k), 'fc_b': u(keys[9], (2,), k),
        'ln_w': jnp.ones((T, H), jnp.float32),   # LayerNorm affine (elementwise, shape [T, H])
        'ln_b': jnp.zeros((T, H), jnp.float32),
    }


def pack_params(tp):
    """Host-side packing of PyTorch-layout weights into kernel-side fused layouts."""
    wih0_t, whh0_t = tp['wih0'].T, tp['whh0'].T
    wih1_t, whh1_t = tp['wih1'].T, tp['whh1'].T
    b0 = tp['bih0'] + tp['bhh0']
    b1 = tp['bih1'] + tp['bhh1']

    # Input projection widened to the full per-step additive term.
    wproj = jnp.concatenate([wih0_t, jnp.zeros((D, H), jnp.float32)], axis=1)  # (D, 2H)
    bcat = jnp.concatenate([b0, b1]).reshape(1, 2 * H)                         # (1, 2H)

    # Block recurrence matrix for the fused state [h0 | h1].
    wcombo = jnp.concatenate([
        jnp.concatenate([whh0_t, wih1_t], axis=1),                             # (H, 2H)
        jnp.concatenate([jnp.zeros((H, H), jnp.float32), whh1_t], axis=1),     # (H, 2H)
    ], axis=0)                                                                 # (2H, 2H)

    # LayerNorm affine + fc folded, restricted to the output tail.
    lnw_t = tp['ln_w'][T - P:, :]
    lnb_t = tp['ln_b'][T - P:, :]
    wfold = jnp.stack([lnw_t * tp['fc_w'][0][None, :],
                       lnw_t * tp['fc_w'][1][None, :]], axis=0)                # (2, P, H)
    wsum = jnp.sum(wfold, axis=-1).T.reshape(1, P, 2)                          # (1, P, 2)
    cfold = jnp.stack(
        [jnp.sum(lnb_t * tp['fc_w'][0][None, :], axis=-1) + tp['fc_b'][0],
         jnp.sum(lnb_t * tp['fc_w'][1][None, :], axis=-1) + tp['fc_b'][1]],
        axis=-1).reshape(1, P, 2)                                              # (1, P, 2)

    return {'wproj': wproj, 'bcat': bcat, 'wcombo': wcombo,
            'wfold': wfold, 'wsum': wsum, 'cfold': cfold}


def reference_forward(x, tp):
    """Pure-JAX reference reproducing the PyTorch forward (eval semantics)."""
    h = jnp.zeros((B, H), jnp.float32)
    outs = []
    for t in range(T):
        h = jnp.tanh(x[:, t, :] @ tp['wih0'].T + h @ tp['whh0'].T
                     + tp['bih0'] + tp['bhh0'])
        outs.append(h)
    seq0 = jnp.stack(outs, axis=1)
    h = jnp.zeros((B, H), jnp.float32)
    outs = []
    for t in range(T):
        h = jnp.tanh(seq0[:, t, :] @ tp['wih1'].T + h @ tp['whh1'].T
                     + tp['bih1'] + tp['bhh1'])
        outs.append(h)
    seq1 = jnp.stack(outs, axis=1)
    mean = jnp.mean(seq1, axis=(1, 2), keepdims=True)
    var = jnp.mean((seq1 - mean) ** 2, axis=(1, 2), keepdims=True)
    normed = (seq1 - mean) / jnp.sqrt(var + LN_EPS) * tp['ln_w'][None] + tp['ln_b'][None]
    logits = jnp.einsum('bth,kh->btk', normed, tp['fc_w']) + tp['fc_b']
    return jax.nn.sigmoid(logits)[:, T - P:, :]


if __name__ == "__main__":
    key = jax.random.PRNGKey(0)
    kx, kp = jax.random.split(key)
    x = jax.random.normal(kx, (B, T, D), jnp.float32)   # batch-first (B, look_back, input_size)
    torch_params = init_torch_params(kp)
    kernel_params = pack_params(torch_params)

    out = model_rnn_forward(x, kernel_params)
    out = jax.block_until_ready(out)

    ref = jax.block_until_ready(reference_forward(x, torch_params))
    np.testing.assert_allclose(np.asarray(out), np.asarray(ref), rtol=1e-3, atol=1e-4)
    assert out.shape == (B, P, 2)

    print("KERNEL_OK")
</pallas_src>

<mosaic_0001>
module attributes {stable_mosaic.version = 11 : i64} {
  func.func @model_rnn_kernel(%arg0: memref<2x8x16xf32, #tpu.memory_space<vmem>>, %arg1: memref<16x64xf32, #tpu.memory_space<vmem>>, %arg2: memref<1x64xf32, #tpu.memory_space<vmem>>, %arg3: memref<64x64xf32, #tpu.memory_space<vmem>>, %arg4: memref<2x4x32xf32, #tpu.memory_space<vmem>>, %arg5: memref<1x4x2xf32, #tpu.memory_space<vmem>>, %arg6: memref<1x4x2xf32, #tpu.memory_space<vmem>>, %arg7: memref<2x4x2xf32, #tpu.memory_space<vmem>>) attributes {dimension_semantics = [], scalar_prefetch = 0 : i64, scratch_operands = 0 : i64, tpu.core_type = #tpu.core_type<tc>} {
    %c0 = arith.constant 0 : index
    %c0_0 = arith.constant 0 : index
    %0 = vector.load %arg3[%c0, %c0_0] : memref<64x64xf32, #tpu.memory_space<vmem>>, vector<64x64xf32>
    %c0_1 = arith.constant 0 : index
    %c0_2 = arith.constant 0 : index
    %1 = vector.load %arg2[%c0_1, %c0_2] : memref<1x64xf32, #tpu.memory_space<vmem>>, vector<1x64xf32>
    %c0_3 = arith.constant 0 : index
    %c0_4 = arith.constant 0 : index
    %c0_5 = arith.constant 0 : index
    %2 = vector.load %arg0[%c0_3, %c0_4, %c0_5] : memref<2x8x16xf32, #tpu.memory_space<vmem>>, vector<2x8x16xf32>
    %3 = vector.shape_cast %2 : vector<2x8x16xf32> to vector<16x16xf32>
    %c0_6 = arith.constant 0 : index
    %c0_7 = arith.constant 0 : index
    %4 = vector.load %arg1[%c0_6, %c0_7] : memref<16x64xf32, #tpu.memory_space<vmem>>, vector<16x64xf32>
    %cst = arith.constant dense<0.000000e+00> : vector<16x64xf32>
    %5 = tpu.matmul %3, %4, %cst {dimension_numbers = #tpu.dot_dimension_numbers<[1], [0], [0], [1], [0, 0, 1, 1], [], []>} : vector<16x16xf32>, vector<16x64xf32>, vector<16x64xf32> -> vector<16x64xf32>
    %6 = vector.broadcast %1 : vector<1x64xf32> to vector<16x64xf32>
    %7 = arith.addf %5, %6 : vector<16x64xf32>
    %8 = vector.shape_cast %7 : vector<16x64xf32> to vector<2x8x64xf32>
    %9 = vector.extract_strided_slice %8 {offsets = [0, 0, 0], sizes = [2, 1, 32], strides = [1, 1, 1]} : vector<2x8x64xf32> to vector<2x1x32xf32>
    %10 = vector.shape_cast %9 : vector<2x1x32xf32> to vector<2x32xf32>
    %11 = math.tanh %10 : vector<2x32xf32>
    %cst_8 = arith.constant 0.000000e+00 : f32
    %12 = vector.broadcast %cst_8 : f32 to vector<2x32xf32>
    %13 = tpu.concatenate %11, %12 in 1 : vector<2x32xf32>, vector<2x32xf32> -> vector<2x64xf32>
    %cst_9 = arith.constant 0.000000e+00 : f32
    %14 = vector.broadcast %cst_9 : f32 to vector<2x1xf32>
    %cst_10 = arith.constant 0.000000e+00 : f32
    %15 = vector.broadcast %cst_10 : f32 to vector<2x1xf32>
    %16 = vector.extract_strided_slice %8 {offsets = [0, 1, 0], sizes = [2, 1, 64], strides = [1, 1, 1]} : vector<2x8x64xf32> to vector<2x1x64xf32>
    %17 = vector.shape_cast %16 : vector<2x1x64xf32> to vector<2x64xf32>
    %cst_11 = arith.constant dense<0.000000e+00> : vector<2x64xf32>
    %18 = tpu.matmul %13, %0, %cst_11 {dimension_numbers = #tpu.dot_dimension_numbers<[1], [0], [0], [1], [0, 0, 1, 1], [], []>} : vector<2x64xf32>, vector<64x64xf32>, vector<2x64xf32> -> vector<2x64xf32>
    %19 = arith.addf %18, %17 : vector<2x64xf32>
    %20 = math.tanh %19 : vector<2x64xf32>
    %21 = vector.extract_strided_slice %20 {offsets = [0, 32], sizes = [2, 32], strides = [1, 1]} : vector<2x64xf32> to vector<2x32xf32>
    %cst_12 = arith.constant dense<0.000000e+00> : vector<2xf32>
    %22 = vector.multi_reduction <add>, %21, %cst_12 [1] : vector<2x32xf32> to vector<2xf32>
    %23 = vector.shape_cast %22 : vector<2xf32> to vector<2x1xf32>
    %24 = arith.addf %14, %23 : vector<2x1xf32>
    %25 = arith.mulf %21, %21 : vector<2x32xf32>
    %cst_13 = arith.constant dense<0.000000e+00> : vector<2xf32>
    %26 = vector.multi_reduction <add>, %25, %cst_13 [1] : vector<2x32xf32> to vector<2xf32>
    %27 = vector.shape_cast %26 : vector<2xf32> to vector<2x1xf32>
    %28 = arith.addf %15, %27 : vector<2x1xf32>
    %29 = vector.extract_strided_slice %8 {offsets = [0, 2, 0], sizes = [2, 1, 64], strides = [1, 1, 1]} : vector<2x8x64xf32> to vector<2x1x64xf32>
    %30 = vector.shape_cast %29 : vector<2x1x64xf32> to vector<2x64xf32>
    %cst_14 = arith.constant dense<0.000000e+00> : vector<2x64xf32>
    %31 = tpu.matmul %20, %0, %cst_14 {dimension_numbers = #tpu.dot_dimension_numbers<[1], [0], [0], [1], [0, 0, 1, 1], [], []>} : vector<2x64xf32>, vector<64x64xf32>, vector<2x64xf32> -> vector<2x64xf32>
    %32 = arith.addf %31, %30 : vector<2x64xf32>
    %33 = math.tanh %32 : vector<2x64xf32>
    %34 = vector.extract_strided_slice %33 {offsets = [0, 32], sizes = [2, 32], strides = [1, 1]} : vector<2x64xf32> to vector<2x32xf32>
    %cst_15 = arith.constant dense<0.000000e+00> : vector<2xf32>
    %35 = vector.multi_reduction <add>, %34, %cst_15 [1] : vector<2x32xf32> to vector<2xf32>
    %36 = vector.shape_cast %35 : vector<2xf32> to vector<2x1xf32>
    %37 = arith.addf %24, %36 : vector<2x1xf32>
    %38 = arith.mulf %34, %34 : vector<2x32xf32>
    %cst_16 = arith.constant dense<0.000000e+00> : vector<2xf32>
    %39 = vector.multi_reduction <add>, %38, %cst_16 [1] : vector<2x32xf32> to vector<2xf32>
    %40 = vector.shape_cast %39 : vector<2xf32> to vector<2x1xf32>
    %41 = arith.addf %28, %40 : vector<2x1xf32>
    %42 = vector.extract_strided_slice %8 {offsets = [0, 3, 0], sizes = [2, 1, 64], strides = [1, 1, 1]} : vector<2x8x64xf32> to vector<2x1x64xf32>
    %43 = vector.shape_cast %42 : vector<2x1x64xf32> to vector<2x64xf32>
    %cst_17 = arith.constant dense<0.000000e+00> : vector<2x64xf32>
    %44 = tpu.matmul %33, %0, %cst_17 {dimension_numbers = #tpu.dot_dimension_numbers<[1], [0], [0], [1], [0, 0, 1, 1], [], []>} : vector<2x64xf32>, vector<64x64xf32>, vector<2x64xf32> -> vector<2x64xf32>
    %45 = arith.addf %44, %43 : vector<2x64xf32>
    %46 = math.tanh %45 : vector<2x64xf32>
    %47 = vector.extract_strided_slice %46 {offsets = [0, 32], sizes = [2, 32], strides = [1, 1]} : vector<2x64xf32> to vector<2x32xf32>
    %cst_18 = arith.constant dense<0.000000e+00> : vector<2xf32>
    %48 = vector.multi_reduction <add>, %47, %cst_18 [1] : vector<2x32xf32> to vector<2xf32>
    %49 = vector.shape_cast %48 : vector<2xf32> to vector<2x1xf32>
    %50 = arith.addf %37, %49 : vector<2x1xf32>
    %51 = arith.mulf %47, %47 : vector<2x32xf32>
    %cst_19 = arith.constant dense<0.000000e+00> : vector<2xf32>
    %52 = vector.multi_reduction <add>, %51, %cst_19 [1] : vector<2x32xf32> to vector<2xf32>
    %53 = vector.shape_cast %52 : vector<2xf32> to vector<2x1xf32>
    %54 = arith.addf %41, %53 : vector<2x1xf32>
    %55 = vector.extract_strided_slice %8 {offsets = [0, 4, 0], sizes = [2, 1, 64], strides = [1, 1, 1]} : vector<2x8x64xf32> to vector<2x1x64xf32>
    %56 = vector.shape_cast %55 : vector<2x1x64xf32> to vector<2x64xf32>
    %cst_20 = arith.constant dense<0.000000e+00> : vector<2x64xf32>
    %57 = tpu.matmul %46, %0, %cst_20 {dimension_numbers = #tpu.dot_dimension_numbers<[1], [0], [0], [1], [0, 0, 1, 1], [], []>} : vector<2x64xf32>, vector<64x64xf32>, vector<2x64xf32> -> vector<2x64xf32>
    %58 = arith.addf %57, %56 : vector<2x64xf32>
    %59 = math.tanh %58 : vector<2x64xf32>
    %60 = vector.extract_strided_slice %59 {offsets = [0, 32], sizes = [2, 32], strides = [1, 1]} : vector<2x64xf32> to vector<2x32xf32>
    %cst_21 = arith.constant dense<0.000000e+00> : vector<2xf32>
    %61 = vector.multi_reduction <add>, %60, %cst_21 [1] : vector<2x32xf32> to vector<2xf32>
    %62 = vector.shape_cast %61 : vector<2xf32> to vector<2x1xf32>
    %63 = arith.addf %50, %62 : vector<2x1xf32>
    %64 = arith.mulf %60, %60 : vector<2x32xf32>
    %cst_22 = arith.constant dense<0.000000e+00> : vector<2xf32>
    %65 = vector.multi_reduction <add>, %64, %cst_22 [1] : vector<2x32xf32> to vector<2xf32>
    %66 = vector.shape_cast %65 : vector<2xf32> to vector<2x1xf32>
    %67 = arith.addf %54, %66 : vector<2x1xf32>
    %68 = vector.extract_strided_slice %8 {offsets = [0, 5, 0], sizes = [2, 1, 64], strides = [1, 1, 1]} : vector<2x8x64xf32> to vector<2x1x64xf32>
    %69 = vector.shape_cast %68 : vector<2x1x64xf32> to vector<2x64xf32>
    %cst_23 = arith.constant dense<0.000000e+00> : vector<2x64xf32>
    %70 = tpu.matmul %59, %0, %cst_23 {dimension_numbers = #tpu.dot_dimension_numbers<[1], [0], [0], [1], [0, 0, 1, 1], [], []>} : vector<2x64xf32>, vector<64x64xf32>, vector<2x64xf32> -> vector<2x64xf32>
    %71 = arith.addf %70, %69 : vector<2x64xf32>
    %72 = math.tanh %71 : vector<2x64xf32>
    %73 = vector.extract_strided_slice %72 {offsets = [0, 32], sizes = [2, 32], strides = [1, 1]} : vector<2x64xf32> to vector<2x32xf32>
    %cst_24 = arith.constant dense<0.000000e+00> : vector<2xf32>
    %74 = vector.multi_reduction <add>, %73, %cst_24 [1] : vector<2x32xf32> to vector<2xf32>
    %75 = vector.shape_cast %74 : vector<2xf32> to vector<2x1xf32>
    %76 = arith.addf %63, %75 : vector<2x1xf32>
    %77 = arith.mulf %73, %73 : vector<2x32xf32>
    %cst_25 = arith.constant dense<0.000000e+00> : vector<2xf32>
    %78 = vector.multi_reduction <add>, %77, %cst_25 [1] : vector<2x32xf32> to vector<2xf32>
    %79 = vector.shape_cast %78 : vector<2xf32> to vector<2x1xf32>
    %80 = arith.addf %67, %79 : vector<2x1xf32>
    %81 = vector.extract_strided_slice %8 {offsets = [0, 6, 0], sizes = [2, 1, 64], strides = [1, 1, 1]} : vector<2x8x64xf32> to vector<2x1x64xf32>
    %82 = vector.shape_cast %81 : vector<2x1x64xf32> to vector<2x64xf32>
    %cst_26 = arith.constant dense<0.000000e+00> : vector<2x64xf32>
    %83 = tpu.matmul %72, %0, %cst_26 {dimension_numbers = #tpu.dot_dimension_numbers<[1], [0], [0], [1], [0, 0, 1, 1], [], []>} : vector<2x64xf32>, vector<64x64xf32>, vector<2x64xf32> -> vector<2x64xf32>
    %84 = arith.addf %83, %82 : vector<2x64xf32>
    %85 = math.tanh %84 : vector<2x64xf32>
    %86 = vector.extract_strided_slice %85 {offsets = [0, 32], sizes = [2, 32], strides = [1, 1]} : vector<2x64xf32> to vector<2x32xf32>
    %cst_27 = arith.constant dense<0.000000e+00> : vector<2xf32>
    %87 = vector.multi_reduction <add>, %86, %cst_27 [1] : vector<2x32xf32> to vector<2xf32>
    %88 = vector.shape_cast %87 : vector<2xf32> to vector<2x1xf32>
    %89 = arith.addf %76, %88 : vector<2x1xf32>
    %90 = arith.mulf %86, %86 : vector<2x32xf32>
    %cst_28 = arith.constant dense<0.000000e+00> : vector<2xf32>
    %91 = vector.multi_reduction <add>, %90, %cst_28 [1] : vector<2x32xf32> to vector<2xf32>
    %92 = vector.shape_cast %91 : vector<2xf32> to vector<2x1xf32>
    %93 = arith.addf %80, %92 : vector<2x1xf32>
    %94 = vector.extract_strided_slice %8 {offsets = [0, 7, 0], sizes = [2, 1, 64], strides = [1, 1, 1]} : vector<2x8x64xf32> to vector<2x1x64xf32>
    %95 = vector.shape_cast %94 : vector<2x1x64xf32> to vector<2x64xf32>
    %cst_29 = arith.constant dense<0.000000e+00> : vector<2x64xf32>
    %96 = tpu.matmul %85, %0, %cst_29 {dimension_numbers = #tpu.dot_dimension_numbers<[1], [0], [0], [1], [0, 0, 1, 1], [], []>} : vector<2x64xf32>, vector<64x64xf32>, vector<2x64xf32> -> vector<2x64xf32>
    %97 = arith.addf %96, %95 : vector<2x64xf32>
    %98 = math.tanh %97 : vector<2x64xf32>
    %99 = vector.extract_strided_slice %98 {offsets = [0, 32], sizes = [2, 32], strides = [1, 1]} : vector<2x64xf32> to vector<2x32xf32>
    %cst_30 = arith.constant dense<0.000000e+00> : vector<2xf32>
    %100 = vector.multi_reduction <add>, %99, %cst_30 [1] : vector<2x32xf32> to vector<2xf32>
    %101 = vector.shape_cast %100 : vector<2xf32> to vector<2x1xf32>
    %102 = arith.addf %89, %101 : vector<2x1xf32>
    %103 = arith.mulf %99, %99 : vector<2x32xf32>
    %cst_31 = arith.constant dense<0.000000e+00> : vector<2xf32>
    %104 = vector.multi_reduction <add>, %103, %cst_31 [1] : vector<2x32xf32> to vector<2xf32>
    %105 = vector.shape_cast %104 : vector<2xf32> to vector<2x1xf32>
    %106 = arith.addf %93, %105 : vector<2x1xf32>
    %cst_32 = arith.constant dense<0.000000e+00> : vector<2x64xf32>
    %107 = tpu.matmul %98, %0, %cst_32 {dimension_numbers = #tpu.dot_dimension_numbers<[1], [0], [0], [1], [0, 0, 1, 1], [], []>} : vector<2x64xf32>, vector<64x64xf32>, vector<2x64xf32> -> vector<2x64xf32>
    %108 = vector.broadcast %1 : vector<1x64xf32> to vector<2x64xf32>
    %109 = arith.addf %107, %108 : vector<2x64xf32>
    %110 = math.tanh %109 : vector<2x64xf32>
    %111 = vector.extract_strided_slice %110 {offsets = [0, 32], sizes = [2, 32], strides = [1, 1]} : vector<2x64xf32> to vector<2x32xf32>
    %cst_33 = arith.constant dense<0.000000e+00> : vector<2xf32>
    %112 = vector.multi_reduction <add>, %111, %cst_33 [1] : vector<2x32xf32> to vector<2xf32>
    %113 = vector.shape_cast %112 : vector<2xf32> to vector<2x1xf32>
    %114 = arith.addf %102, %113 : vector<2x1xf32>
    %115 = arith.mulf %111, %111 : vector<2x32xf32>
    %cst_34 = arith.constant dense<0.000000e+00> : vector<2xf32>
    %116 = vector.multi_reduction <add>, %115, %cst_34 [1] : vector<2x32xf32> to vector<2xf32>
    %117 = vector.shape_cast %116 : vector<2xf32> to vector<2x1xf32>
    %118 = arith.addf %106, %117 : vector<2x1xf32>
    %cst_35 = arith.constant 3.906250e-03 : f32
    %119 = vector.broadcast %cst_35 : f32 to vector<2x1xf32>
    %120 = arith.mulf %114, %119 : vector<2x1xf32>
    %cst_36 = arith.constant 3.906250e-03 : f32
    %121 = vector.broadcast %cst_36 : f32 to vector<2x1xf32>
    %122 = arith.mulf %118, %121 : vector<2x1xf32>
    %123 = arith.mulf %120, %120 : vector<2x1xf32>
    %124 = arith.subf %122, %123 : vector<2x1xf32>
    %cst_37 = arith.constant 9.99999974E-6 : f32
    %125 = vector.broadcast %cst_37 : f32 to vector<2x1xf32>
    %126 = arith.addf %124, %125 : vector<2x1xf32>
    %127 = math.rsqrt %126 : vector<2x1xf32>
    %128 = vector.shape_cast %73 : vector<2x32xf32> to vector<2x1x32xf32>
    %129 = vector.shape_cast %86 : vector<2x32xf32> to vector<2x1x32xf32>
    %130 = vector.shape_cast %99 : vector<2x32xf32> to vector<2x1x32xf32>
    %131 = vector.shape_cast %111 : vector<2x32xf32> to vector<2x1x32xf32>
    %132 = tpu.concatenate %128, %129, %130, %131 in 1 : vector<2x1x32xf32>, vector<2x1x32xf32>, vector<2x1x32xf32>, vector<2x1x32xf32> -> vector<2x4x32xf32>
    %c0_38 = arith.constant 0 : index
    %c0_39 = arith.constant 0 : index
    %c0_40 = arith.constant 0 : index
    %133 = vector.load %arg4[%c0_38, %c0_39, %c0_40] : memref<2x4x32xf32, #tpu.memory_space<vmem>>, vector<2x4x32xf32>
    %134 = vector.extract_strided_slice %133 {offsets = [0, 0, 0], sizes = [1, 4, 32], strides = [1, 1, 1]} : vector<2x4x32xf32> to vector<1x4x32xf32>
    %135 = vector.shape_cast %134 : vector<1x4x32xf32> to vector<4x32xf32>
    %136 = vector.shape_cast %135 : vector<4x32xf32> to vector<1x4x32xf32>
    %137 = vector.broadcast %136 : vector<1x4x32xf32> to vector<2x4x32xf32>
    %138 = arith.mulf %132, %137 : vector<2x4x32xf32>
    %cst_41 = arith.constant dense<0.000000e+00> : vector<2x4xf32>
    %139 = vector.multi_reduction <add>, %138, %cst_41 [2] : vector<2x4x32xf32> to vector<2x4xf32>
    %140 = vector.shape_cast %139 : vector<2x4xf32> to vector<2x4x1xf32>
    %141 = vector.extract_strided_slice %133 {offsets = [1, 0, 0], sizes = [1, 4, 32], strides = [1, 1, 1]} : vector<2x4x32xf32> to vector<1x4x32xf32>
    %142 = vector.shape_cast %141 : vector<1x4x32xf32> to vector<4x32xf32>
    %143 = vector.shape_cast %142 : vector<4x32xf32> to vector<1x4x32xf32>
    %144 = vector.broadcast %143 : vector<1x4x32xf32> to vector<2x4x32xf32>
    %145 = arith.mulf %132, %144 : vector<2x4x32xf32>
    %cst_42 = arith.constant dense<0.000000e+00> : vector<2x4xf32>
    %146 = vector.multi_reduction <add>, %145, %cst_42 [2] : vector<2x4x32xf32> to vector<2x4xf32>
    %147 = vector.shape_cast %146 : vector<2x4xf32> to vector<2x4x1xf32>
    %148 = tpu.concatenate %140, %147 in 2 : vector<2x4x1xf32>, vector<2x4x1xf32> -> vector<2x4x2xf32>
    %149 = vector.shape_cast %127 : vector<2x1xf32> to vector<2x1x1xf32>
    %150 = vector.shape_cast %120 : vector<2x1xf32> to vector<2x1x1xf32>
    %c0_43 = arith.constant 0 : index
    %c0_44 = arith.constant 0 : index
    %c0_45 = arith.constant 0 : index
    %151 = vector.load %arg5[%c0_43, %c0_44, %c0_45] : memref<1x4x2xf32, #tpu.memory_space<vmem>>, vector<1x4x2xf32>
    %152 = vector.broadcast %150 : vector<2x1x1xf32> to vector<2x4x2xf32>
    %153 = vector.broadcast %151 : vector<1x4x2xf32> to vector<2x4x2xf32>
    %154 = arith.mulf %152, %153 : vector<2x4x2xf32>
    %155 = arith.subf %148, %154 : vector<2x4x2xf32>
    %156 = vector.broadcast %149 : vector<2x1x1xf32> to vector<2x4x2xf32>
    %157 = arith.mulf %156, %155 : vector<2x4x2xf32>
    %c0_46 = arith.constant 0 : index
    %c0_47 = arith.constant 0 : index
    %c0_48 = arith.constant 0 : index
    %158 = vector.load %arg6[%c0_46, %c0_47, %c0_48] : memref<1x4x2xf32, #tpu.memory_space<vmem>>, vector<1x4x2xf32>
    %159 = vector.broadcast %158 : vector<1x4x2xf32> to vector<2x4x2xf32>
    %160 = arith.addf %157, %159 : vector<2x4x2xf32>
    %161 = arith.negf %160 : vector<2x4x2xf32>
    %162 = math.exp %161 : vector<2x4x2xf32>
    %cst_49 = arith.constant 1.000000e+00 : f32
    %163 = vector.broadcast %cst_49 : f32 to vector<2x4x2xf32>
    %164 = arith.addf %163, %162 : vector<2x4x2xf32>
    %165 = arith.divf %163, %164 : vector<2x4x2xf32>
    %c0_50 = arith.constant 0 : index
    %c0_51 = arith.constant 0 : index
    %c0_52 = arith.constant 0 : index
    %166 = vector.load %arg7[%c0_50, %c0_51, %c0_52] : memref<2x4x2xf32, #tpu.memory_space<vmem>>, vector<2x4x2xf32>
    tpu.vector_store %arg7[%c0_50, %c0_51, %c0_52], %165 {strides = array<i32>} : memref<2x4x2xf32, #tpu.memory_space<vmem>>, vector<2x4x2xf32>,
    return
  }
}

</mosaic_0001>

<bundles_post_ra>
// kernel: tpu_custom_call.1
= control target key start
LH: loop header
LB: loop body
LE: loop exit
PB: predicated region body
PF: predicated region fallthrough
CT: control target
= control target key end

     0   :  { %12 = vsyncpa [#allocation3], 0  ;;  %s1968_s0 = inlined_call_operand.hbm [shape: f32[2,8,16], index: 0, kind: input, shape index: {}]   ;;  %s1969_s1 = inlined_call_operand.hbm [shape: f32[16,64], index: 1, kind: input, shape index: {}]   ;;  %s1970_s2 = inlined_call_operand.vmem [shape: f32[1,64], index: 2, kind: input, shape index: {}]   ;;  %s1971_s3 = inlined_call_operand.hbm [shape: f32[64,64], index: 3, kind: input, shape index: {}]   ;;  %s1972_s4 = inlined_call_operand.vmem [shape: f32[2,4,32], index: 4, kind: input, shape index: {}]   ;;  %s1973_s5 = inlined_call_operand.vmem [shape: f32[1,4,2], index: 5, kind: input, shape index: {}]   ;;  %s1974_s6 = inlined_call_operand.vmem [shape: f32[1,4,2], index: 6, kind: input, shape index: {}]   ;;  %s1975_s7 = inlined_call_operand.vmem [shape: f32[2,4,2], index: 7, kind: output, shape index: {}]  }
   0x1   :  { %13 = vsyncpa [#allocation5], 0  ;;  %s1623_s24 = smov [#allocation4]   ;;  %s1624_s26 = smov [#allocation2]  }
   0x2   :  { %s31_s25 = sshll.u32 %s1623_s24, 4  ;;  %s19_s27 = sshll.u32 %s1624_s26, 4  ;;  %s32_s25 = int_to_ptr.vmem [resolvable:$true] %s31_s25  ;;  %s1674_s27 = int_to_ptr.vmem [resolvable:$true] %s19_s27 }
   0x3   :  { %s1553_s30 = scalar_lea.hbm %s1969_s1, 256 }
   0x4   :  { %p1554_p0 = scmp.ne.s32.totalorder %s1969_s1, %s1553_s30  ;;  %p1557_p1 = scmp.lt.u32.totalorder %s1553_s30, %s1969_s1 }
   0x6   :  { %p1559_p2 = pnand %p1557_p1, %p1554_p0 }
   0x8   :  { %1562 = shalt.err (!%p1559_p2)
}
   0x9   :  { %s1563_s12 = scalar_lea.vmem %s32_s25, 256  ;;  %p1568_p4 = scmp.lt.s32.totalorder %s32_s25, %s32_s25 }
   0xa   :  { %p1564_p3 = scmp.ne.s32.totalorder %s32_s25, %s1563_s12  ;;  %p1569_p5 = scmp.lt.s32.totalorder %s1563_s12, %s1563_s12 }
   0xc   :  { %p1570_p6 = por %p1569_p5, %p1568_p4 }
   0xe   :  { %p1571_p7 = pnand %p1570_p6, %p1564_p3 }
  0x10   :  { %1574 = shalt.err (!%p1571_p7)
}
  0x11   :  { %s1625_s13 = smov 128   ;;  %s1626_s14 = smov 8  }
  0x12   :  { %37 = dma.hbm_to_vmem [thread:$0]  %s1969_s1, 256, %s32_s25, [#allocation5], %s1625_s13, %s1625_s13, %s1626_s14  }
  0x13   :  { %s1575_s19 = scalar_lea.hbm %s1968_s0, 256 }
  0x14   :  { %p1576_p8 = scmp.ne.s32.totalorder %s1968_s0, %s1575_s19  ;;  %p1579_p9 = scmp.lt.u32.totalorder %s1575_s19, %s1968_s0 }
  0x16   :  { %p1581_p10 = pnand %p1579_p9, %p1576_p8 }
  0x18   :  { %1584 = shalt.err (!%p1581_p10)
}
  0x19   :  { %s1585_s24 = scalar_lea.vmem %s1674_s27, 256  ;;  %p1590_p12 = scmp.lt.s32.totalorder %s1674_s27, %s1674_s27 }
  0x1a   :  { %p1586_p11 = scmp.ne.s32.totalorder %s1674_s27, %s1585_s24  ;;  %p1591_p13 = scmp.lt.s32.totalorder %s1585_s24, %s1585_s24 }
  0x1c   :  { %p1592_p0 = por %p1591_p13, %p1590_p12 }
  0x1e   :  { %p1593_p1 = pnand %p1592_p0, %p1586_p11 }
  0x20   :  { %1596 = shalt.err (!%p1593_p1)
}
  0x21   :  { %25 = dma.hbm_to_vmem [thread:$0]  %s1968_s0, 256, %s1674_s27, [#allocation3], %s1625_s13, %s1625_s13, %s1626_s14  }
  0x22   :  { %s1627_s26 = smov [#allocation6]   ;;  %s1597_s8 = scalar_lea.hbm %s1971_s3, 1024 }
  0x23   :  { %s45_s28 = sshll.u32 %s1627_s26, 4  ;;  %p1598_p2 = scmp.ne.s32.totalorder %s1971_s3, %s1597_s8  ;;  %s46_s28 = int_to_ptr.vmem [resolvable:$true] %s45_s28 }
  0x24   :  { %p1601_p3 = scmp.lt.u32.totalorder %s1597_s8, %s1971_s3 }
  0x26   :  { %p1603_p4 = pnand %p1601_p3, %p1598_p2 }
  0x28   :  { %1606 = shalt.err (!%p1603_p4)
}
  0x29   :  { %s1607_s15 = scalar_lea.vmem %s46_s28, 1024  ;;  %p1612_p6 = scmp.lt.s32.totalorder %s46_s28, %s46_s28 }
  0x2a   :  { %p1608_p5 = scmp.ne.s32.totalorder %s46_s28, %s1607_s15  ;;  %p1613_p7 = scmp.lt.s32.totalorder %s1607_s15, %s1607_s15 }
  0x2c   :  { %p1614_p8 = por %p1613_p7, %p1612_p6 }
  0x2e   :  { %p1615_p9 = pnand %p1614_p8, %p1608_p5 }
  0x30   :  { %1618 = shalt.err (!%p1615_p9)
}
  0x31   :  { %51 = dma.hbm_to_vmem [thread:$0]  %s1971_s3, 1024, %s46_s28, [#allocation5], %s1625_s13, %s1625_s13, %s1626_s14  }
  0x32   :  { %1619 = dma.done.wait [#allocation3], 256  }
  0x33   :  { %1620 = vsyncadd [#allocation3], 4294967040 }
  0x34   :  { %1621 = dma.done.wait [#allocation5], 1280  }
  0x35   :  { %1622 = vsyncadd [#allocation5], 4294966016  ;;  %vm86_vm0 = vcmask 130048   ;;  %v78_v0 = vld [vmem:[#allocation4] sm:$0xff]  ;;  %v79_v1 = vld [vmem:[#allocation4 + $0x8] sm:$0xff]  ;;  %v1628_v8 = vmov 0.0|0.0  }
  0x36   :  { %v76_v2 = vld [vmem:[#allocation2] sm:$0xff]  ;;  %v1412_v3 = vpack.c.bf16 %v79_v1, %v78_v0  ;;  %v77_v4 = vld [vmem:[#allocation2 + $0x8] sm:$0xff]  ;;  %1416 = vmatprep.subr.bf16.mxu1 %v1628_v8  ;;  %v69_v9 = vld [vmem:[#allocation6 + $0x10] sm:$0xff]  ;;  %vm1629_vm1 = vmmov 0   ;;  %v1630_v12 = vmov 0.0   ;;  %vm173_vm2 = vcmask 1041409  }
  0x37   :  { %1257 = vmatprep.mubr.msk.f32.mxu0 %vm86_vm0, %v76_v2  ;;  %v67_v5 = vld [vmem:[#allocation6] sm:$0xff]  ;;  %v68_v6 = vld [vmem:[#allocation6 + $0x8] sm:$0xff]  ;;  %v70_v10 = vld [vmem:[#allocation6 + $0x18] sm:$0xff]  ;;  %1276 = vmatprep.mubr.msk.f32.mxu1 %vm1629_vm1, %v1630_v12  ;;  %vm176_vm3 = vcmask 261120   ;;  %vm183_vm4 = vcmask 523264   ;;  %s1631_s18 = smov 32  }
  0x38   :  { %1413 = vmatprep.subr.bf16.mxu0 %v1412_v3  ;;  %v1726_v7 = vpack.c.bf16 %v68_v6, %v67_v5  ;;  %v1731_v11 = vpack.c.bf16 %v70_v10, %v69_v9  ;;  %v71_v13 = vld [vmem:[#allocation6 + $0x20] sm:$0xff]  ;;  %v72_v14 = vld [vmem:[#allocation6 + $0x28] sm:$0xff]  ;;  %v73_v16 = vld [vmem:[#allocation6 + $0x30] sm:$0xff]  ;;  %s1632_s19 = smov 96   ;;  %vm262_vm5 = vcmask 254976   ;;  %vm1056_vm6 = vcmask 1040384  }
  0x39   :  { %1415 = vmatpush3.bf16.msra.mxu0 %v1412_v3  ;;  %v1741_v15 = vpack.c.bf16 %v72_v14, %v71_v13  ;;  %v74_v17 = vld [vmem:[#allocation6 + $0x38] sm:$0xff]  ;;  %v1759_v19 = vld [vmem:[%s1970_s2] ss:$0 sm:$0xff]  ;;  %v1066_v49 = vld [vmem:[%s1972_s4 + $0x4] sm:$0xf]  ;;  %vm1059_vm7 = vcmask 1041408  }
  0x3a   :  { %1428 = vmatprep.subr.bf16.mxu0 %v1628_v8  ;;  %1418 = vmatpush3.bf16.msra.mxu1 %v1726_v7  ;;  %v1747_v18 = vpack.c.bf16 %v74_v17, %v73_v16  ;;  %v1065_v50 = vld [vmem:[%s1972_s4] sm:$0xf]  ;;  %vm1062_vm8 = vcmask 1042432   ;;  %vm1081_vm9 = vcmask 257024   ;;  %vm1108_vm10 = vcmask 7168  }
  0x3b   :  { %1419 = vmatprep.subr.bf16.mxu1 %v1628_v8  ;;  %1089 = vrot.lane.b32.xlu0 %v1066_v49, %s1631_s18  ;;  %v1633_v49 = vmov 1966171168   ;;  %vm1155_vm11 = vcmask 11264  }
  0x3c   :  { %1258 = vmatmul.mubr.msk.f32.vlgmr.msra.gmra.mrb[0].mxu0 %vm86_vm0, %v77_v4  ;;  %1068 = vrot.lane.b32.xlu1 %v1065_v50, %s1631_s18  ;;  %v939_v50 = vlaneseq }
  0x3d   :  { %1430 = vmatpush3.bf16.msra.mxu0 %v1726_v7  ;;  %1295 = vmatprep.mubr.msk.f32.mxu0 %vm1629_vm1, %v1630_v12 }
  0x3e   :  { %1431 = vmatprep.subr.bf16.mxu0 %v1628_v8  ;;  %1421 = vmatpush3.bf16.msra.mxu1 %v1731_v11 }
  0x3f   :  { %1422 = vmatprep.subr.bf16.mxu1 %v1628_v8 }
  0x41   :  { %1433 = vmatpush3.bf16.msra.mxu0 %v1731_v11 }
  0x42   :  { %1434 = vmatprep.subr.bf16.mxu0 %v1628_v8  ;;  %1424 = vmatpush3.bf16.msra.mxu1 %v1741_v15 }
  0x43   :  { %1425 = vmatprep.subr.bf16.mxu1 %v1628_v8 }
  0x45   :  { %1436 = vmatpush3.bf16.msra.mxu0 %v1741_v15 }
  0x46   :  { %1437 = vmatprep.subr.bf16.mxu0 %v1628_v8  ;;  %1427 = vmatpush3.bf16.msra.mxu1 %v1747_v18 }
  0x47   :  { %1440 = vmatprep.subr.bf16.mxu1 %v1628_v8 }
  0x49   :  { %1439 = vmatpush3.bf16.msra.mxu0 %v1747_v18 }
  0x4a   :  { %1452 = vmatprep.subr.bf16.mxu0 %v1628_v8 }
  0xad   :  { %v1811_v56 = vpop.permute.xlu0 %1089 }
  0xae   :  { %v1813_v57 = vpop.permute.xlu1 %1068 }
 0x10f   :  { %v1259_v20 = vpop.f32.mrb[0].mxu0 }
 0x110   :  { %v165_v21 = vadd.f32 %v1259_v20, %v1759_v19  ;;  %v159_v22 = vpop.f32.mrb[1].mxu0 }
 0x111   :  { %v160_v23 = vadd.f32 %v1759_v19, %v159_v22 }
 0x112   :  { %1523 = vtanh.f32 %v165_v21  ;;  %v277_v24 = vrot.slane %v165_v21, 1  ;;  %v371_v25 = vrot.slane %v165_v21, 2  ;;  %v465_v26 = vrot.slane %v165_v21, 3 }
 0x113   :  { %1525 = vtanh.f32 %v160_v23  ;;  %v180_v27 = vrot.slane %v160_v23, 1  ;;  %v276_v28 = vrot.slane %v160_v23, 2  ;;  %v370_v29 = vrot.slane %v160_v23, 3 }
 0x114   :  { %v464_v30 = vrot.slane %v160_v23, 4  ;;  %v558_v31 = vrot.slane %v160_v23, 5  ;;  %v559_v32 = vrot.slane %v165_v21, 4  ;;  %v652_v33 = vrot.slane %v160_v23, 6 }
 0x115   :  { %v181_v34 = vsel %vm173_vm2, %v165_v21, %v180_v27  ;;  %v278_v35 = vsel %vm173_vm2, %v277_v24, %v276_v28  ;;  %v1766_v36 = vsel %vm173_vm2, %v371_v25, %v370_v29  ;;  %v653_v37 = vrot.slane %v165_v21, 5 }
 0x116   :  { %v1769_v38 = vsel %vm173_vm2, %v465_v26, %v464_v30  ;;  %v1772_v39 = vsel %vm173_vm2, %v559_v32, %v558_v31  ;;  %v746_v40 = vrot.slane %v160_v23, 7  ;;  %v747_v41 = vrot.slane %v165_v21, 6 }
 0x117   :  { %v1775_v42 = vsel %vm173_vm2, %v653_v37, %v652_v33 }
 0x118   :  { %v1778_v43 = vsel %vm173_vm2, %v747_v41, %v746_v40 }
 0x11c   :  { %v1524_v44 = vpop.eup %1523 }
 0x11d   :  { %v1526_v45 = vpop.eup %1525  ;;  %v172_v46 = vrot.slane %v1524_v44, 7 }
 0x11f   :  { %v174_v47 = vsel %vm173_vm2, %v172_v46, %v1526_v45 }
 0x120   :  { %v177_v48 = vsel %vm176_vm3, %v174_v47, 0.0 }
 0x121   :  { %1277 = vmatmul.mubr.msk.f32.vlgmr.msra.gmra.mrb[0].mxu1 %vm183_vm4, %v177_v48 }
 0x122   :  { %1442 = vmatpush3.bf16.msra.mxu1 %v1726_v7  ;;  %1314 = vmatprep.mubr.msk.f32.mxu1 %vm1629_vm1, %v1630_v12 }
 0x123   :  { %1443 = vmatprep.subr.bf16.mxu1 %v1628_v8 }
 0x126   :  { %1445 = vmatpush3.bf16.msra.mxu1 %v1731_v11 }
 0x127   :  { %1446 = vmatprep.subr.bf16.mxu1 %v1628_v8 }
 0x12a   :  { %1448 = vmatpush3.bf16.msra.mxu1 %v1741_v15 }
 0x12b   :  { %1449 = vmatprep.subr.bf16.mxu1 %v1628_v8 }
 0x12e   :  { %1451 = vmatpush3.bf16.msra.mxu1 %v1747_v18 }
 0x12f   :  { %1464 = vmatprep.subr.bf16.mxu1 %v1628_v8 }
 0x1f4   :  { %v253_v51 = vpop.f32.mrb[0].mxu1 }
 0x1f5   :  { %v254_v52 = vadd.f32 %v253_v51, %v181_v34  ;;  %v1278_v53 = vpop.f32.mrb[1].mxu1 }
 0x1f7   :  { %1527 = vtanh.f32 %v254_v52  ;;  %v1891_v52 = vshrl.u32 %v939_v50, 7 }
 0x201   :  { %v1528_v54 = vpop.eup %1527 }
 0x202   :  { %259 = vrot.lane.b32.xlu0 %v1528_v54, %s1632_s19  ;;  %1296 = vmatmul.mubr.msk.f32.vlgmr.msra.gmra.mrb[2].mxu0 %vm183_vm4, %v1528_v54  ;;  %v267_v55 = vmul.f32 %v1528_v54, %v1528_v54 }
 0x203   :  { %1454 = vmatpush3.bf16.msra.mxu0 %v1726_v7  ;;  %1333 = vmatprep.mubr.msk.f32.mxu0 %vm1629_vm1, %v1630_v12 }
 0x204   :  { %269 = vrot.lane.b32.xlu1 %v267_v55, %s1632_s19  ;;  %1455 = vmatprep.subr.bf16.mxu0 %v1628_v8 }
 0x207   :  { %1457 = vmatpush3.bf16.msra.mxu0 %v1731_v11 }
 0x208   :  { %1458 = vmatprep.subr.bf16.mxu0 %v1628_v8 }
 0x20b   :  { %1460 = vmatpush3.bf16.msra.mxu0 %v1741_v15 }
 0x20c   :  { %1461 = vmatprep.subr.bf16.mxu0 %v1628_v8 }
 0x20f   :  { %1463 = vmatpush3.bf16.msra.mxu0 %v1747_v18 }
 0x210   :  { %1476 = vmatprep.subr.bf16.mxu0 %v1628_v8 }
 0x274   :  { %v260_v58 = vpop.permute.xlu0 %259 }
 0x275   :  { %v263_v59 = vsel %vm262_vm5, %v260_v58, 0.0 }
 0x276   :  { %264 = vadd.xlane.f32.xlu0 %v263_v59  ;;  %v270_v60 = vpop.permute.xlu1 %269 }
 0x277   :  { %v272_v61 = vsel %vm262_vm5, %v270_v60, 0.0 }
 0x278   :  { %273 = vadd.xlane.f32.xlu1 %v272_v61 }
 0x2d5   :  { %v348_v62 = vpop.f32.mrb[2].mxu0 }
 0x2d6   :  { %v349_v63 = vadd.f32 %v348_v62, %v278_v35  ;;  %v1297_v0 = vpop.f32.mrb[3].mxu0 }
 0x2d8   :  { %1529 = vtanh.f32 %v349_v63 }
 0x2e2   :  { %v1530_v1 = vpop.eup %1529 }
 0x2e3   :  { %354 = vrot.lane.b32.xlu0 %v1530_v1, %s1632_s19  ;;  %1315 = vmatmul.mubr.msk.f32.vlgmr.msra.gmra.mrb[2].mxu1 %vm183_vm4, %v1530_v1  ;;  %v361_v2 = vmul.f32 %v1530_v1, %v1530_v1 }
 0x2e4   :  { %1466 = vmatpush3.bf16.msra.mxu1 %v1726_v7  ;;  %1352 = vmatprep.mubr.msk.f32.mxu1 %vm1629_vm1, %v1630_v12 }
 0x2e5   :  { %363 = vrot.lane.b32.xlu1 %v361_v2, %s1632_s19  ;;  %1467 = vmatprep.subr.bf16.mxu1 %v1628_v8 }
 0x2e8   :  { %1469 = vmatpush3.bf16.msra.mxu1 %v1731_v11 }
 0x2e9   :  { %1470 = vmatprep.subr.bf16.mxu1 %v1628_v8 }
 0x2ec   :  { %1472 = vmatpush3.bf16.msra.mxu1 %v1741_v15 }
 0x2ed   :  { %1473 = vmatprep.subr.bf16.mxu1 %v1628_v8 }
 0x2f0   :  { %1475 = vmatpush3.bf16.msra.mxu1 %v1747_v18 }
 0x2f1   :  { %1488 = vmatprep.subr.bf16.mxu1 %v1628_v8 }
 0x303   :  { %v1830_v3 = vpop.xlane.xlu0 %264 }
 0x305   :  { %v1832_v4 = vpop.xlane.xlu1 %273 }
 0x355   :  { %v355_v5 = vpop.permute.xlu0 %354 }
 0x356   :  { %v357_v6 = vsel %vm262_vm5, %v355_v5, 0.0 }
 0x357   :  { %358 = vadd.xlane.f32.xlu1 %v357_v6  ;;  %v364_v9 = vpop.permute.xlu1 %363 }
 0x358   :  { %v366_v10 = vsel %vm262_vm5, %v364_v9, 0.0 }
 0x359   :  { %367 = vadd.xlane.f32.xlu0 %v366_v10 }
 0x3b6   :  { %v442_v13 = vpop.f32.mrb[2].mxu1 }
 0x3b7   :  { %v443_v14 = vadd.f32 %v442_v13, %v1766_v36  ;;  %v1316_v16 = vpop.f32.mrb[3].mxu1 }
 0x3b9   :  { %1531 = vtanh.f32 %v443_v14 }
 0x3c3   :  { %v1532_v17 = vpop.eup %1531 }
 0x3c4   :  { %448 = vrot.lane.b32.xlu1 %v1532_v17, %s1632_s19  ;;  %1334 = vmatmul.mubr.msk.f32.vlgmr.msra.gmra.mrb[4].mxu0 %vm183_vm4, %v1532_v17  ;;  %v455_v20 = vmul.f32 %v1532_v17, %v1532_v17 }
 0x3c5   :  { %1478 = vmatpush3.bf16.msra.mxu0 %v1726_v7  ;;  %1371 = vmatprep.mubr.msk.f32.mxu0 %vm1629_vm1, %v1630_v12 }
 0x3c6   :  { %457 = vrot.lane.b32.xlu0 %v455_v20, %s1632_s19  ;;  %1479 = vmatprep.subr.bf16.mxu0 %v1628_v8 }
 0x3c9   :  { %1481 = vmatpush3.bf16.msra.mxu0 %v1731_v11 }
 0x3ca   :  { %1482 = vmatprep.subr.bf16.mxu0 %v1628_v8 }
 0x3cd   :  { %1484 = vmatpush3.bf16.msra.mxu0 %v1741_v15 }
 0x3ce   :  { %1485 = vmatprep.subr.bf16.mxu0 %v1628_v8 }
 0x3d1   :  { %1487 = vmatpush3.bf16.msra.mxu0 %v1747_v18 }
 0x3d2   :  { %1500 = vmatprep.subr.bf16.mxu0 %v1628_v8 }
 0x3e4   :  { %v1850_v21 = vpop.xlane.xlu1 %358 }
 0x3e5   :  { %v360_v9 = vadd.f32 %v1850_v21, %v1830_v3 }
 0x3e6   :  { %v1852_v22 = vpop.xlane.xlu0 %367 }
 0x436   :  { %v449_v23 = vpop.permute.xlu1 %448 }
 0x437   :  { %v451_v24 = vsel %vm262_vm5, %v449_v23, 0.0 }
 0x438   :  { %452 = vadd.xlane.f32.xlu1 %v451_v24  ;;  %v458_v25 = vpop.permute.xlu0 %457 }
 0x439   :  { %v460_v26 = vsel %vm262_vm5, %v458_v25, 0.0 }
 0x43c   :  { %461 = vadd.xlane.f32.xlu1 %v460_v26 }
 0x497   :  { %v536_v27 = vpop.f32.mrb[4].mxu0 }
 0x498   :  { %v537_v28 = vadd.f32 %v536_v27, %v1769_v38  ;;  %v1335_v29 = vpop.f32.mrb[5].mxu0 }
 0x49a   :  { %1533 = vtanh.f32 %v537_v28 }
 0x4a4   :  { %v1534_v30 = vpop.eup %1533 }
 0x4a5   :  { %1353 = vmatmul.mubr.msk.f32.vlgmr.msra.gmra.mrb[4].mxu1 %vm183_vm4, %v1534_v30  ;;  %542 = vrot.lane.b32.xlu1 %v1534_v30, %s1632_s19  ;;  %v549_v31 = vmul.f32 %v1534_v30, %v1534_v30 }
 0x4a6   :  { %1490 = vmatpush3.bf16.msra.mxu1 %v1726_v7  ;;  %1390 = vmatprep.mubr.msk.f32.mxu1 %vm1629_vm1, %v1630_v12 }
 0x4a7   :  { %1491 = vmatprep.subr.bf16.mxu1 %v1628_v8 }
 0x4a9   :  { %551 = vrot.lane.b32.xlu1 %v549_v31, %s1632_s19 }
 0x4aa   :  { %1493 = vmatpush3.bf16.msra.mxu1 %v1731_v11 }
 0x4ab   :  { %1494 = vmatprep.subr.bf16.mxu1 %v1628_v8 }
 0x4ae   :  { %1496 = vmatpush3.bf16.msra.mxu1 %v1741_v15 }
 0x4af   :  { %1497 = vmatprep.subr.bf16.mxu1 %v1628_v8 }
 0x4b2   :  { %1499 = vmatpush3.bf16.msra.mxu1 %v1747_v18 }
 0x4c5   :  { %v1869_v32 = vpop.xlane.xlu1 %452 }
 0x4c6   :  { %v454_v13 = vadd.f32 %v1869_v32, %v360_v9 }
 0x4c9   :  { %v1871_v33 = vpop.xlane.xlu1 %461 }
 0x517   :  { %v543_v34 = vpop.permute.xlu1 %542 }
 0x518   :  { %v545_v35 = vsel %vm262_vm5, %v543_v34, 0.0 }
 0x519   :  { %546 = vadd.xlane.f32.xlu0 %v545_v35 }
 0x51b   :  { %v552_v36 = vpop.permute.xlu1 %551 }
 0x51c   :  { %v554_v37 = vsel %vm262_vm5, %v552_v36, 0.0 }
 0x51d   :  { %555 = vadd.xlane.f32.xlu1 %v554_v37 }
 0x578   :  { %v630_v38 = vpop.f32.mrb[4].mxu1 }
 0x579   :  { %v631_v40 = vadd.f32 %v630_v38, %v1772_v39  ;;  %v1354_v41 = vpop.f32.mrb[5].mxu1 }
 0x57b   :  { %1535 = vtanh.f32 %v631_v40 }
 0x585   :  { %v1536_v44 = vpop.eup %1535 }
 0x586   :  { %636 = vrot.lane.b32.xlu0 %v1536_v44, %s1632_s19  ;;  %1372 = vmatmul.mubr.msk.f32.vlgmr.msra.gmra.mrb[6].mxu0 %vm183_vm4, %v1536_v44  ;;  %v643_v45 = vmul.f32 %v1536_v44, %v1536_v44 }
 0x587   :  { %1502 = vmatpush3.bf16.msra.mxu0 %v1726_v7  ;;  %1409 = vmatprep.mubr.msk.f32.mxu0 %vm1629_vm1, %v1630_v12 }
 0x588   :  { %1503 = vmatprep.subr.bf16.mxu0 %v1628_v8 }
 0x58a   :  { %645 = vrot.lane.b32.xlu0 %v643_v45, %s1632_s19 }
 0x58b   :  { %1505 = vmatpush3.bf16.msra.mxu0 %v1731_v11  ;;  %v937_v11 = vunpack.c.l.s4 %v1633_v49 }
 0x58c   :  { %1506 = vmatprep.subr.bf16.mxu0 %v1628_v8 }
 0x58f   :  { %1508 = vmatpush3.bf16.msra.mxu0 %v1741_v15 }
 0x590   :  { %1509 = vmatprep.subr.bf16.mxu0 %v1628_v8  ;;  %v938_v8 = vunpack.c.0.s8 %v937_v11 }
 0x593   :  { %1511 = vmatpush3.bf16.msra.mxu0 %v1747_v18  ;;  %v1894_v18 = vsub.s32 %v938_v8, %v1891_v52 }
 0x595   :  { %v942_v53 = vrot.slane %v1536_v44, %v1894_v18 }
 0x597   :  { %v943_v60 = vcombine.high %v942_v53, %v942_v53  ;;  %v950_v62 = vrot.slane %v942_v53, %v1894_v18 }
 0x599   :  { %v957_v2 = vrot.slane %v943_v60, %v1894_v18 }
 0x5a6   :  { %v547_v39 = vpop.xlane.xlu0 %546 }
 0x5a7   :  { %v548_v14 = vadd.f32 %v547_v39, %v454_v13  ;;  %v369_v13 = vadd.f32 %v1852_v22, %v1832_v4 }
 0x5aa   :  { %v1912_v10 = vpop.xlane.xlu1 %555 }
 0x5f8   :  { %v637_v7 = vpop.permute.xlu0 %636 }
 0x5f9   :  { %v639_v46 = vsel %vm262_vm5, %v637_v7, 0.0 }
 0x5fa   :  { %640 = vadd.xlane.f32.xlu1 %v639_v46 }
 0x5fc   :  { %v646_v12 = vpop.permute.xlu0 %645 }
 0x5fd   :  { %v648_v47 = vsel %vm262_vm5, %v646_v12, 0.0 }
 0x5fe   :  { %649 = vadd.xlane.f32.xlu1 %v648_v47 }
 0x659   :  { %v724_v48 = vpop.f32.mrb[6].mxu0 }
 0x65a   :  { %v725_v51 = vadd.f32 %v724_v48, %v1775_v42  ;;  %v1373_v15 = vpop.f32.mrb[7].mxu0  ;;  %v1901_v42 = vsub.s32 0, %v1891_v52 }
 0x65c   :  { %1537 = vtanh.f32 %v725_v51 }
 0x666   :  { %v1538_v54 = vpop.eup %1537 }
 0x667   :  { %1391 = vmatmul.mubr.msk.f32.vlgmr.msra.gmra.mrb[6].mxu1 %vm183_vm4, %v1538_v54  ;;  %730 = vrot.lane.b32.xlu0 %v1538_v54, %s1632_s19  ;;  %v737_v55 = vmul.f32 %v1538_v54, %v1538_v54  ;;  %v966_v58 = vrot.slane %v1538_v54, %v1894_v18 }
 0x669   :  { %739 = vrot.lane.b32.xlu1 %v737_v55, %s1632_s19  ;;  %v974_v59 = vrot.slane %v966_v58, %v1894_v18  ;;  %v967_v61 = vcombine.high %v966_v58, %v966_v58 }
 0x66b   :  { %v1029_v63 = vrot.slane %v974_v59, %v1901_v42  ;;  %v981_v0 = vrot.slane %v967_v61, %v1894_v18 }
 0x66d   :  { %v1057_v1 = vsel %vm1056_vm6, %v950_v62, %v1029_v63  ;;  %v1033_v5 = vrot.slane %v981_v0, %v1901_v42 }
 0x66f   :  { %v1058_v6 = vsel %vm1056_vm6, %v957_v2, %v1033_v5 }
 0x687   :  { %v641_v16 = vpop.xlane.xlu1 %640 }
 0x688   :  { %v642_v17 = vadd.f32 %v641_v16, %v548_v14  ;;  %v463_v14 = vadd.f32 %v1871_v33, %v369_v13  ;;  %v1118_v33 = vsub.s32 1, %v1891_v52 }
 0x68b   :  { %v1915_v20 = vpop.xlane.xlu1 %649 }
 0x6d9   :  { %v731_v23 = vpop.permute.xlu0 %730 }
 0x6da   :  { %v733_v24 = vsel %vm262_vm5, %v731_v23, 0.0 }
 0x6db   :  { %v740_v25 = vpop.permute.xlu1 %739  ;;  %734 = vadd.xlane.f32.xlu0 %v733_v24 }
 0x6dc   :  { %v742_v26 = vsel %vm262_vm5, %v740_v25, 0.0 }
 0x6df   :  { %743 = vadd.xlane.f32.xlu0 %v742_v26 }
 0x73a   :  { %v818_v27 = vpop.f32.mrb[6].mxu1 }
 0x73b   :  { %v819_v3 = vadd.f32 %v818_v27, %v1778_v43  ;;  %v1392_v21 = vpop.f32.mrb[7].mxu1 }
 0x73d   :  { %1539 = vtanh.f32 %v819_v3 }
 0x747   :  { %v1540_v28 = vpop.eup %1539 }
 0x748   :  { %824 = vrot.lane.b32.xlu1 %v1540_v28, %s1632_s19  ;;  %1410 = vmatmul.mubr.msk.f32.vlgmr.msra.gmra.mrb[8].mxu0 %vm183_vm4, %v1540_v28  ;;  %v988_v29 = vrot.slane %v1540_v28, %v1894_v18  ;;  %v831_v30 = vmul.f32 %v1540_v28, %v1540_v28 }
 0x74a   :  { %v996_v31 = vrot.slane %v988_v29, %v1894_v18  ;;  %v989_v32 = vcombine.high %v988_v29, %v988_v29 }
 0x74c   :  { %833 = vrot.lane.b32.xlu1 %v831_v30, %s1632_s19  ;;  %v1039_v34 = vrot.slane %v996_v31, %v1901_v42  ;;  %v1003_v43 = vrot.slane %v989_v32, %v1894_v18 }
 0x74e   :  { %v1060_v35 = vsel %vm1059_vm7, %v1057_v1, %v1039_v34  ;;  %v1043_v36 = vrot.slane %v1003_v43, %v1901_v42 }
 0x750   :  { %v1061_v37 = vsel %vm1059_vm7, %v1058_v6, %v1043_v36 }
 0x768   :  { %v735_v38 = vpop.xlane.xlu0 %734 }
 0x769   :  { %v736_v40 = vadd.f32 %v735_v38, %v642_v17  ;;  %v557_v17 = vadd.f32 %v1912_v10, %v463_v14 }
 0x76b   :  { %v651_v23 = vadd.f32 %v1915_v20, %v557_v17 }
 0x76c   :  { %v744_v62 = vpop.xlane.xlu0 %743 }
 0x76d   :  { %v745_v27 = vadd.f32 %v744_v62, %v651_v23 }
 0x81b   :  { %v908_v41 = vpop.f32.mrb[8].mxu0 }
 0x81c   :  { %v909_v44 = vadd.f32 %v1759_v19, %v908_v41  ;;  %v1411_v45 = vpop.f32.mrb[9].mxu0 }
 0x81e   :  { %1541 = vtanh.f32 %v909_v44 }
 0x828   :  { %v1542_v39 = vpop.eup %1541 }
 0x829   :  { %914 = vrot.lane.b32.xlu1 %v1542_v39, %s1632_s19  ;;  %v1010_v7 = vrot.slane %v1542_v39, %v1894_v18  ;;  %v921_v46 = vmul.f32 %v1542_v39, %v1542_v39 }
 0x82b   :  { %v1018_v12 = vrot.slane %v1010_v7, %v1894_v18  ;;  %v1011_v47 = vcombine.high %v1010_v7, %v1010_v7 }
 0x82d   :  { %923 = vrot.lane.b32.xlu1 %v921_v46, %s1632_s19  ;;  %v1049_v48 = vrot.slane %v1018_v12, %v1901_v42  ;;  %v1025_v49 = vrot.slane %v1011_v47, %v1894_v18  ;;  %v825_v18 = vpop.permute.xlu1 %824  ;;  %v1140_v12 = vld [vmem:[%s1974_s6] sm:$0xf] }
 0x82e   :  { %v827_v58 = vsel %vm262_vm5, %v825_v18, 0.0 }
 0x82f   :  { %v1063_v11 = vsel %vm1062_vm8, %v1060_v35, %v1049_v48  ;;  %v1053_v19 = vrot.slane %v1025_v49, %v1901_v42 }
 0x830   :  { %v1071_v50 = vmul.f32 %v1813_v57, %v1063_v11  ;;  %v1092_v8 = vmul.f32 %v1811_v56, %v1063_v11 }
 0x831   :  { %v1064_v51 = vsel %vm1062_vm8, %v1061_v37, %v1053_v19  ;;  %v834_v54 = vpop.permute.xlu1 %833  ;;  %v1133_v37 = vld [vmem:[%s1973_s5] sm:$0xf] }
 0x832   :  { %1075 = vrot.lane.b32.xlu1 %v1071_v50, %s1632_s19  ;;  %v1072_v15 = vmul.f32 %v1813_v57, %v1064_v51  ;;  %v1093_v53 = vmul.f32 %v1811_v56, %v1064_v51  ;;  %v836_v55 = vsel %vm262_vm5, %v834_v54, 0.0 }
 0x834   :  { %1077 = vrot.lane.b32.xlu0 %v1072_v15, %s1632_s19 }
 0x836   :  { %1096 = vrot.lane.b32.xlu1 %v1092_v8, %s1632_s19 }
 0x83a   :  { %1098 = vrot.lane.b32.xlu1 %v1093_v53, %s1632_s19 }
 0x853   :  { %837 = vadd.xlane.f32.xlu0 %v836_v55 }
 0x85e   :  { %828 = vadd.xlane.f32.xlu1 %v827_v58 }
 0x89b   :  { %v915_v59 = vpop.permute.xlu1 %914 }
 0x89c   :  { %v917_v57 = vsel %vm262_vm5, %v915_v59, 0.0 }
 0x89d   :  { %918 = vadd.xlane.f32.xlu1 %v917_v57 }
 0x89f   :  { %v924_v60 = vpop.permute.xlu1 %923 }
 0x8a0   :  { %v926_v61 = vsel %vm262_vm5, %v924_v60, 0.0 }
 0x8a1   :  { %927 = vadd.xlane.f32.xlu1 %v926_v61 }
 0x8a4   :  { %v1076_v56 = vpop.permute.xlu1 %1075 }
 0x8a5   :  { %v1082_v63 = vsel %vm1081_vm9, %v1076_v56, 0.0 }
 0x8a6   :  { %v1078_v0 = vpop.permute.xlu0 %1077  ;;  %1083 = vadd.xlane.f32.xlu0 %v1082_v63 }
 0x8a7   :  { %v1085_v1 = vsel %vm1081_vm9, %v1078_v0, 0.0 }
 0x8a8   :  { %1086 = vadd.xlane.f32.xlu1 %v1085_v1  ;;  %v1097_v2 = vpop.permute.xlu1 %1096 }
 0x8a9   :  { %v1102_v5 = vsel %vm1081_vm9, %v1097_v2, 0.0 }
 0x8aa   :  { %1103 = vadd.xlane.f32.xlu0 %v1102_v5 }
 0x8ac   :  { %v1099_v6 = vpop.permute.xlu1 %1098 }
 0x8ad   :  { %v1105_v9 = vsel %vm1081_vm9, %v1099_v6, 0.0 }
 0x8ae   :  { %1106 = vadd.xlane.f32.xlu1 %v1105_v9 }
 0x8e0   :  { %v838_v25 = vpop.xlane.xlu0 %837 }
 0x8e1   :  { %v839_v21 = vadd.f32 %v838_v25, %v745_v27 }
 0x8eb   :  { %v829_v16 = vpop.xlane.xlu1 %828 }
 0x8ec   :  { %v830_v24 = vadd.f32 %v829_v16, %v736_v40 }
 0x92a   :  { %v919_v26 = vpop.xlane.xlu1 %918 }
 0x92b   :  { %v920_v3 = vadd.f32 %v919_v26, %v830_v24 }
 0x92d   :  { %v930_v28 = vmul.f32 0.00390625, %v920_v3 }
 0x92e   :  { %v928_v29 = vpop.xlane.xlu1 %927 }
 0x92f   :  { %v929_v30 = vadd.f32 %v928_v29, %v839_v21  ;;  %v932_v31 = vmul.f32 %v930_v28, %v930_v28  ;;  %v1126_v20 = vrot.slane %v930_v28, %v1901_v42  ;;  %v1130_v43 = vrot.slane %v930_v28, %v1118_v33 }
 0x931   :  { %v931_v32 = vmul.f32 0.00390625, %v929_v30  ;;  %v1134_v41 = vmul.f32 %v1133_v37, %v1126_v20  ;;  %v1135_v44 = vmul.f32 %v1133_v37, %v1130_v43 }
 0x933   :  { %v933_v34 = vsub.f32 %v931_v32, %v932_v31  ;;  %v1084_v22 = vpop.xlane.xlu0 %1083 }
 0x935   :  { %v934_v4 = vadd.f32 1e-05, %v933_v34  ;;  %v1087_v10 = vpop.xlane.xlu1 %1086 }
 0x937   :  { %1543 = vrsqrt.f32 %v934_v4  ;;  %v1104_v35 = vpop.xlane.xlu0 %1103 }
 0x938   :  { %v1109_v38 = vsel %vm1108_vm10, %v1084_v22, %v1104_v35 }
 0x939   :  { %v1136_v7 = vsub.f32 %v1109_v38, %v1134_v41 }
 0x93b   :  { %v1107_v36 = vpop.xlane.xlu1 %1106 }
 0x93c   :  { %v1110_v40 = vsel %vm1108_vm10, %v1087_v10, %v1107_v36 }
 0x93d   :  { %v1137_v46 = vsub.f32 %v1110_v40, %v1135_v44 }
 0x941   :  { %v1544_v45 = vpop.eup %1543 }
 0x942   :  { %v1115_v39 = vrot.slane %v1544_v45, %v1901_v42  ;;  %v1119_v52 = vrot.slane %v1544_v45, %v1118_v33 }
 0x944   :  { %v1138_v47 = vmul.f32 %v1136_v7, %v1115_v39  ;;  %v1139_v48 = vmul.f32 %v1137_v46, %v1119_v52 }
 0x946   :  { %v1141_v49 = vadd.f32 %v1140_v12, %v1138_v47  ;;  %v1142_v11 = vadd.f32 %v1140_v12, %v1139_v48 }
 0x948   :  { %v1175_v19 = vmul.f32 -1.442695, %v1141_v49  ;;  %v1176_v50 = vmul.f32 -1.442695, %v1142_v11 }
 0x94a   :  { %1545 = vpow2.f32 %v1175_v19 }
 0x94b   :  { %1547 = vpow2.f32 %v1176_v50 }
 0x954   :  { %v1546_v51 = vpop.eup %1545 }
 0x955   :  { %v1548_v15 = vpop.eup %1547  ;;  %v1149_v8 = vadd.f32 1.0, %v1546_v51 }
 0x956   :  { %v1150_v53 = vadd.f32 1.0, %v1548_v15 }
 0x957   :  { %1549 = vrcp.f32 %v1149_v8 }
 0x958   :  { %1551 = vrcp.f32 %v1150_v53 }
 0x961   :  { %v1550_v42 = vpop.eup %1549 }
 0x962   :  { %v1552_v18 = vpop.eup %1551  ;;  %1156 = vst.msk [vmem:[%s1975_s7] sm:$0xf] %vm1155_vm11, %v1550_v42 }
 0x963   :  { %1157 = vst.msk [vmem:[%s1975_s7 + $0x4] sm:$0xf] %vm1155_vm11, %v1552_v18 }
 0x964   :  { %1162 = vsyncpa [#allocation3], 1 }
 0x965   :  { %1163 = vsyncpa [#allocation5], 1 }

</bundles_post_ra>
